<compile_context>
chip_gen: v6e
topology: v6e:2x2x1
jax: 0.10.0
libtpu: 0.0.40
codegen_flags: <defaults>
</compile_context>

<pallas_src>
import functools

import jax
import jax.numpy as jnp
from jax.experimental import pallas as pl
from jax.experimental.pallas import tpu as pltpu


# ---------------------------------------------------------------------------
# Pallas kernels
# ---------------------------------------------------------------------------

def _conv_matmul_kernel(colsT_ref, w_ref, b_ref, o_ref):
    """convT = relu(W_flat @ colsT + b).

    colsT : (K_pad, M)   im2col patches, transposed (M = B*oH*oW)
    w     : (c_hid, K_pad)
    b     : (c_hid, 1)
    o     : (c_hid, M)   lane-dense output (M is a multiple of 128 here)
    """
    acc = jnp.dot(w_ref[...], colsT_ref[...], preferred_element_type=jnp.float32)
    acc = acc + b_ref[...]
    o_ref[...] = jnp.maximum(acc, 0.0).astype(o_ref.dtype)


def _vae_tail_kernel(feat_ref, mw_ref, mb_ref, lw_ref, lb_ref,
                     dw_ref, db_ref, noise_ref,
                     mean_ref, logvar_ref, dec_ref):
    """Fused: mean head, log_var head, reparameterize, decoder + sigmoid.

    feat  : (B, F)
    mw/lw : (F, latent),  mb/lb : (1, latent)
    dw    : (latent, out), db   : (1, out)
    noise : (B, latent)
    outputs: mean (B, latent), log_var (B, latent), dec (B, out)
    """
    feat = feat_ref[...]

    mean = jnp.dot(feat, mw_ref[...], preferred_element_type=jnp.float32)
    mean = mean + mb_ref[...]

    log_var = jnp.dot(feat, lw_ref[...], preferred_element_type=jnp.float32)
    log_var = log_var + lb_ref[...]

    # reparameterization: z = mean + exp(0.5 * log_var) * N(0, 1)
    std = jnp.exp(0.5 * log_var)
    z = mean + std * noise_ref[...]

    dec = jnp.dot(z, dw_ref[...], preferred_element_type=jnp.float32)
    dec = jax.nn.sigmoid(dec + db_ref[...])

    mean_ref[...] = mean.astype(mean_ref.dtype)
    logvar_ref[...] = log_var.astype(logvar_ref.dtype)
    dec_ref[...] = dec.astype(dec_ref.dtype)


_VMEM_SPEC = pl.BlockSpec(memory_space=pltpu.MemorySpace.VMEM)


def conv_relu_transposed(colsT, w_flat, b_col):
    c_hid = w_flat.shape[0]
    M = colsT.shape[1]
    return pl.pallas_call(
        _conv_matmul_kernel,
        out_shape=jax.ShapeDtypeStruct((c_hid, M), colsT.dtype),
        in_specs=[_VMEM_SPEC, _VMEM_SPEC, _VMEM_SPEC],
        out_specs=_VMEM_SPEC,
    )(colsT, w_flat, b_col)


def vae_tail(feat, mean_w, mean_b, lvar_w, lvar_b, dec_w, dec_b, noise):
    B = feat.shape[0]
    latent = mean_w.shape[1]
    out_dim = dec_w.shape[1]
    return pl.pallas_call(
        _vae_tail_kernel,
        out_shape=(
            jax.ShapeDtypeStruct((B, latent), feat.dtype),
            jax.ShapeDtypeStruct((B, latent), feat.dtype),
            jax.ShapeDtypeStruct((B, out_dim), feat.dtype),
        ),
        in_specs=[_VMEM_SPEC] * 8,
        out_specs=(_VMEM_SPEC, _VMEM_SPEC, _VMEM_SPEC),
    )(feat, mean_w, mean_b, lvar_w, lvar_b, dec_w, dec_b, noise)


# ---------------------------------------------------------------------------
# Glue: im2col for the encoder conv (3x3, stride 2, pad 1), transposed + padded
# ---------------------------------------------------------------------------

def im2col_3x3_s2_p1_T(x_nhwc, k_pad):
    """x:(B,H,W,C) -> colsT:(k_pad, B*oH*oW), inner K-order (cin, kh, kw)
    matching a PyTorch (Cout, Cin, 3, 3) weight flattened to (Cout, Cin*9)."""
    B, H, W, C = x_nhwc.shape
    oH = (H + 2 - 3) // 2 + 1
    oW = (W + 2 - 3) // 2 + 1
    xp = jnp.pad(x_nhwc, ((0, 0), (1, 1), (1, 1), (0, 0)))
    patches = []
    for kh in range(3):
        for kw in range(3):
            patches.append(
                xp[:, kh:kh + 2 * (oH - 1) + 1:2, kw:kw + 2 * (oW - 1) + 1:2, :])
    cols = jnp.stack(patches, axis=-1)              # (B,oH,oW,C,9), kh*3+kw order
    cols = cols.reshape(B * oH * oW, C * 9)         # inner order (cin, kh, kw)
    colsT = cols.T                                  # (C*9, B*oH*oW)
    colsT = jnp.pad(colsT, ((0, k_pad - C * 9), (0, 0)))
    return colsT, (oH, oW)


# ---------------------------------------------------------------------------
# Model: deterministic synthetic parameters
#   encoder_conv : Conv2d(C_in -> C_hid, 3x3, stride 2, pad 1) + ReLU, flatten
#   encoder_mean : Linear(flat -> latent)
#   encoder_lvar : Linear(flat -> latent)
#   decoder      : Linear(latent -> C_in*H*W) + Sigmoid, reshape to NCHW
# ---------------------------------------------------------------------------

def init_params(key, c_in=4, c_hid=8, h=16, w=16, latent=32):
    oH, oW = h // 2, w // 2
    flat = c_hid * oH * oW
    out = c_in * h * w
    ks = jax.random.split(key, 8)
    s = 0.05
    return {
        "conv_w": s * jax.random.normal(ks[0], (c_hid, c_in, 3, 3), jnp.float32),
        "conv_b": s * jax.random.normal(ks[1], (c_hid,), jnp.float32),
        "mean_w": s * jax.random.normal(ks[2], (flat, latent), jnp.float32),
        "mean_b": s * jax.random.normal(ks[3], (latent,), jnp.float32),
        "lvar_w": s * jax.random.normal(ks[4], (flat, latent), jnp.float32),
        "lvar_b": s * jax.random.normal(ks[5], (latent,), jnp.float32),
        "dec_w": s * jax.random.normal(ks[6], (latent, out), jnp.float32),
        "dec_b": s * jax.random.normal(ks[7], (out,), jnp.float32),
    }


def vae_forward(params, x_nchw, noise_key):
    B, C, H, W = x_nchw.shape
    c_hid = params["conv_w"].shape[0]
    latent = params["mean_w"].shape[1]

    x_nhwc = jnp.transpose(x_nchw, (0, 2, 3, 1))

    # --- encoder_conv: Conv2d(3x3, s2, p1) + ReLU via im2col + Pallas matmul ---
    K = C * 9
    k_pad = ((K + 7) // 8) * 8                      # pad contraction dim to 8n
    colsT, (oH, oW) = im2col_3x3_s2_p1_T(x_nhwc, k_pad)
    w_flat = params["conv_w"].reshape(c_hid, K)
    w_flat = jnp.pad(w_flat, ((0, 0), (0, k_pad - K)))
    b_col = params["conv_b"].reshape(c_hid, 1)

    convT = conv_relu_transposed(colsT, w_flat, b_col)   # (c_hid, B*oH*oW)

    # flatten PyTorch-style (c, h, w); tiny 4 KB XLA reshape between kernels
    S = oH * oW
    feat = convT.reshape(c_hid, B, S).transpose(1, 0, 2).reshape(B, c_hid * S)

    # --- fused tail: mean / log_var heads + reparameterize + decoder ---
    noise = jax.random.normal(noise_key, (B, latent), x_nchw.dtype)
    mean, log_var, dec = vae_tail(
        feat,
        params["mean_w"], params["mean_b"].reshape(1, -1),
        params["lvar_w"], params["lvar_b"].reshape(1, -1),
        params["dec_w"], params["dec_b"].reshape(1, -1),
        noise)

    output = dec.reshape(B, C, H, W)
    return output, mean, log_var


if __name__ == "__main__":
    B, C, H, W = 2, 4, 16, 16
    latent = 32

    key = jax.random.PRNGKey(0)
    k_param, k_input, k_noise = jax.random.split(key, 3)

    params = init_params(k_param, c_in=C, c_hid=8, h=H, w=W, latent=latent)
    x = jax.random.normal(k_input, (B, C, H, W), jnp.float32)   # NCHW input

    fwd = jax.jit(vae_forward)
    output, mean, log_var = fwd(params, x, k_noise)
    jax.block_until_ready(output)

    assert output.shape == (B, C, H, W)
    assert mean.shape == (B, latent) and log_var.shape == (B, latent)
    assert bool(jnp.all(jnp.isfinite(output)))
    assert bool(jnp.all(output >= 0.0)) and bool(jnp.all(output <= 1.0))
    print("KERNEL_OK")
</pallas_src>

<mosaic_0001>
module attributes {stable_mosaic.version = 11 : i64} {
  func.func @_conv_matmul_kernel(%arg0: memref<40x128xf32, #tpu.memory_space<vmem>>, %arg1: memref<8x40xf32, #tpu.memory_space<vmem>>, %arg2: memref<8x1xf32, #tpu.memory_space<vmem>>, %arg3: memref<8x128xf32, #tpu.memory_space<vmem>>) attributes {dimension_semantics = [], scalar_prefetch = 0 : i64, scratch_operands = 0 : i64, tpu.core_type = #tpu.core_type<tc>} {
    %c0 = arith.constant 0 : index
    %c0_0 = arith.constant 0 : index
    %0 = vector.load %arg1[%c0, %c0_0] : memref<8x40xf32, #tpu.memory_space<vmem>>, vector<8x40xf32>
    %c0_1 = arith.constant 0 : index
    %c0_2 = arith.constant 0 : index
    %1 = vector.load %arg0[%c0_1, %c0_2] : memref<40x128xf32, #tpu.memory_space<vmem>>, vector<40x128xf32>
    %cst = arith.constant dense<0.000000e+00> : vector<8x128xf32>
    %2 = tpu.matmul %0, %1, %cst {dimension_numbers = #tpu.dot_dimension_numbers<[1], [0], [0], [1], [0, 0, 1, 1], [], []>} : vector<8x40xf32>, vector<40x128xf32>, vector<8x128xf32> -> vector<8x128xf32>
    %c0_3 = arith.constant 0 : index
    %c0_4 = arith.constant 0 : index
    %3 = vector.load %arg2[%c0_3, %c0_4] : memref<8x1xf32, #tpu.memory_space<vmem>>, vector<8x1xf32>
    %4 = vector.broadcast %3 : vector<8x1xf32> to vector<8x128xf32>
    %5 = arith.addf %2, %4 : vector<8x128xf32>
    %cst_5 = arith.constant 0.000000e+00 : f32
    %6 = vector.broadcast %cst_5 : f32 to vector<8x128xf32>
    %7 = arith.maximumf %5, %6 : vector<8x128xf32>
    %c0_6 = arith.constant 0 : index
    %c0_7 = arith.constant 0 : index
    %8 = vector.load %arg3[%c0_6, %c0_7] : memref<8x128xf32, #tpu.memory_space<vmem>>, vector<8x128xf32>
    tpu.vector_store %arg3[%c0_6, %c0_7], %7 {strides = array<i32>} : memref<8x128xf32, #tpu.memory_space<vmem>>, vector<8x128xf32>,
    return
  }
}

module attributes {stable_mosaic.version = 11 : i64} {
  func.func @_vae_tail_kernel(%arg0: memref<2x512xf32, #tpu.memory_space<vmem>>, %arg1: memref<512x32xf32, #tpu.memory_space<vmem>>, %arg2: memref<1x32xf32, #tpu.memory_space<vmem>>, %arg3: memref<512x32xf32, #tpu.memory_space<vmem>>, %arg4: memref<1x32xf32, #tpu.memory_space<vmem>>, %arg5: memref<32x1024xf32, #tpu.memory_space<vmem>>, %arg6: memref<1x1024xf32, #tpu.memory_space<vmem>>, %arg7: memref<2x32xf32, #tpu.memory_space<vmem>>, %arg8: memref<2x32xf32, #tpu.memory_space<vmem>>, %arg9: memref<2x32xf32, #tpu.memory_space<vmem>>, %arg10: memref<2x1024xf32, #tpu.memory_space<vmem>>) attributes {dimension_semantics = [], scalar_prefetch = 0 : i64, scratch_operands = 0 : i64, tpu.core_type = #tpu.core_type<tc>} {
    %c0 = arith.constant 0 : index
    %c0_0 = arith.constant 0 : index
    %0 = vector.load %arg0[%c0, %c0_0] : memref<2x512xf32, #tpu.memory_space<vmem>>, vector<2x512xf32>
    %c0_1 = arith.constant 0 : index
    %c0_2 = arith.constant 0 : index
    %1 = vector.load %arg1[%c0_1, %c0_2] : memref<512x32xf32, #tpu.memory_space<vmem>>, vector<512x32xf32>
    %cst = arith.constant dense<0.000000e+00> : vector<2x32xf32>
    %2 = tpu.matmul %0, %1, %cst {dimension_numbers = #tpu.dot_dimension_numbers<[1], [0], [0], [1], [0, 0, 1, 1], [], []>} : vector<2x512xf32>, vector<512x32xf32>, vector<2x32xf32> -> vector<2x32xf32>
    %c0_3 = arith.constant 0 : index
    %c0_4 = arith.constant 0 : index
    %3 = vector.load %arg2[%c0_3, %c0_4] : memref<1x32xf32, #tpu.memory_space<vmem>>, vector<1x32xf32>
    %4 = vector.broadcast %3 : vector<1x32xf32> to vector<2x32xf32>
    %5 = arith.addf %2, %4 : vector<2x32xf32>
    %c0_5 = arith.constant 0 : index
    %c0_6 = arith.constant 0 : index
    %6 = vector.load %arg3[%c0_5, %c0_6] : memref<512x32xf32, #tpu.memory_space<vmem>>, vector<512x32xf32>
    %cst_7 = arith.constant dense<0.000000e+00> : vector<2x32xf32>
    %7 = tpu.matmul %0, %6, %cst_7 {dimension_numbers = #tpu.dot_dimension_numbers<[1], [0], [0], [1], [0, 0, 1, 1], [], []>} : vector<2x512xf32>, vector<512x32xf32>, vector<2x32xf32> -> vector<2x32xf32>
    %c0_8 = arith.constant 0 : index
    %c0_9 = arith.constant 0 : index
    %8 = vector.load %arg4[%c0_8, %c0_9] : memref<1x32xf32, #tpu.memory_space<vmem>>, vector<1x32xf32>
    %9 = vector.broadcast %8 : vector<1x32xf32> to vector<2x32xf32>
    %10 = arith.addf %7, %9 : vector<2x32xf32>
    %cst_10 = arith.constant 5.000000e-01 : f32
    %11 = vector.broadcast %cst_10 : f32 to vector<2x32xf32>
    %12 = arith.mulf %11, %10 : vector<2x32xf32>
    %13 = math.exp %12 : vector<2x32xf32>
    %c0_11 = arith.constant 0 : index
    %c0_12 = arith.constant 0 : index
    %14 = vector.load %arg7[%c0_11, %c0_12] : memref<2x32xf32, #tpu.memory_space<vmem>>, vector<2x32xf32>
    %15 = arith.mulf %13, %14 : vector<2x32xf32>
    %16 = arith.addf %5, %15 : vector<2x32xf32>
    %c0_13 = arith.constant 0 : index
    %c0_14 = arith.constant 0 : index
    %17 = vector.load %arg5[%c0_13, %c0_14] : memref<32x1024xf32, #tpu.memory_space<vmem>>, vector<32x1024xf32>
    %cst_15 = arith.constant dense<0.000000e+00> : vector<2x1024xf32>
    %18 = tpu.matmul %16, %17, %cst_15 {dimension_numbers = #tpu.dot_dimension_numbers<[1], [0], [0], [1], [0, 0, 1, 1], [], []>} : vector<2x32xf32>, vector<32x1024xf32>, vector<2x1024xf32> -> vector<2x1024xf32>
    %c0_16 = arith.constant 0 : index
    %c0_17 = arith.constant 0 : index
    %19 = vector.load %arg6[%c0_16, %c0_17] : memref<1x1024xf32, #tpu.memory_space<vmem>>, vector<1x1024xf32>
    %20 = vector.broadcast %19 : vector<1x1024xf32> to vector<2x1024xf32>
    %21 = arith.addf %18, %20 : vector<2x1024xf32>
    %22 = arith.negf %21 : vector<2x1024xf32>
    %23 = math.exp %22 : vector<2x1024xf32>
    %cst_18 = arith.constant 1.000000e+00 : f32
    %24 = vector.broadcast %cst_18 : f32 to vector<2x1024xf32>
    %25 = arith.addf %24, %23 : vector<2x1024xf32>
    %26 = arith.divf %24, %25 : vector<2x1024xf32>
    %c0_19 = arith.constant 0 : index
    %c0_20 = arith.constant 0 : index
    %27 = vector.load %arg8[%c0_19, %c0_20] : memref<2x32xf32, #tpu.memory_space<vmem>>, vector<2x32xf32>
    tpu.vector_store %arg8[%c0_19, %c0_20], %5 {strides = array<i32>} : memref<2x32xf32, #tpu.memory_space<vmem>>, vector<2x32xf32>,
    %c0_21 = arith.constant 0 : index
    %c0_22 = arith.constant 0 : index
    %28 = vector.load %arg9[%c0_21, %c0_22] : memref<2x32xf32, #tpu.memory_space<vmem>>, vector<2x32xf32>
    tpu.vector_store %arg9[%c0_21, %c0_22], %10 {strides = array<i32>} : memref<2x32xf32, #tpu.memory_space<vmem>>, vector<2x32xf32>,
    %c0_23 = arith.constant 0 : index
    %c0_24 = arith.constant 0 : index
    %29 = vector.load %arg10[%c0_23, %c0_24] : memref<2x1024xf32, #tpu.memory_space<vmem>>, vector<2x1024xf32>
    tpu.vector_store %arg10[%c0_23, %c0_24], %26 {strides = array<i32>} : memref<2x1024xf32, #tpu.memory_space<vmem>>, vector<2x1024xf32>,
    return
  }
}

</mosaic_0001>

<bundles_post_ra>
// kernel: vae_forward.2
= control target key start
LH: loop header
LB: loop body
LE: loop exit
PB: predicated region body
PF: predicated region fallthrough
CT: control target
= control target key end

     0   :  { %v130_v0 = vmov 0.0   ;;  %vm131_vm0 = vmmov 0   ;;  %v132_v3 = vmov 0   ;;  %vm26_vm1 = vcmask 326656   ;;  %s177_s0 = inlined_call_operand.vmem [shape: f32[40,128], index: 0, kind: input, shape index: {}]   ;;  %s178_s2 = inlined_call_operand.vmem [shape: f32[8,1], index: 2, kind: input, shape index: {}]   ;;  %s179_s1 = inlined_call_operand.vmem [shape: f32[8,40], index: 1, kind: input, shape index: {}]   ;;  %s180_s3 = inlined_call_operand.vmem [shape: f32[8,128], index: 3, kind: output, shape index: {}]  }
   0x1   :  { %113 = vmatprep.subr.mxu0 %v130_v0  ;;  %v19_v1 = vld [vmem:[%s177_s0 + $0x20] sm:$0xff]  ;;  %v18_v2 = vld [vmem:[%s177_s0 + $0x18] sm:$0xff]  ;;  %123 = vmatprep.mubr.msk.f32.mxu0 %vm131_vm0, %v130_v0  ;;  %v17_v4 = vld [vmem:[%s177_s0 + $0x10] sm:$0xff] }
   0x2   :  { %114 = vmatpush3.msra.mxu0 %v19_v1  ;;  %129 = vset.pattern.permute.xlu0 %v132_v3  ;;  %v20_v5 = vld [vmem:[%s178_s2] sm:$0xff]  ;;  %v16_v6 = vld [vmem:[%s177_s0 + $0x8] sm:$0xff] }
   0x3   :  { %115 = vmatprep.subr.mxu0 %v130_v0  ;;  %23 = vperm.xlu0 %129, %v20_v5   ;;  %v15_v7 = vld [vmem:[%s177_s0] sm:$0xff] }
   0x4   :  { %116 = vmatpush3.msra.mxu0 %v18_v2  ;;  %v14_v8 = vld [vmem:[%s179_s1] sm:$0xff] }
   0x5   :  { %117 = vmatprep.subr.mxu0 %v130_v0 }
   0x6   :  { %118 = vmatpush3.msra.mxu0 %v17_v4 }
   0x7   :  { %119 = vmatprep.subr.mxu0 %v130_v0 }
   0x8   :  { %120 = vmatpush3.msra.mxu0 %v16_v6 }
   0x9   :  { %121 = vmatprep.subr.mxu0 %v130_v0 }
   0xa   :  { %122 = vmatpush3.msra.mxu0 %v15_v7 }
   0xb   :  { %124 = vmatmul.mubr.msk.f32.vlgmr.msra.gmra.mxu0 %vm26_vm1, %v14_v8 }
  0x7e   :  { %v24_v9 = vpop.permute.xlu0 %23 }
  0xcb   :  { %v96_v10 = vpop.f32.mrf.mxu0 }
  0xcc   :  { %v97_v11 = vadd.f32 %v96_v10, %v24_v9 }
  0xcd   :  { %v125_v12 = vpop.f32.mrf.mxu0 }
  0xce   :  { %v100_v13 = vmax.f32 %v97_v11, 0.0 }
  0xd0   :  { %101 = vst [vmem:[%s180_s3] sm:$0xff] %v100_v13 }

// kernel: vae_forward.3
= control target key start
LH: loop header
LB: loop body
LE: loop exit
PB: predicated region body
PF: predicated region fallthrough
CT: control target
= control target key end

     0   :  { %16 = vsyncpa [#allocation3], 0  ;;  %v1213_v30 = vmov 1983009808   ;;  %v111_v32 = vlaneseq  ;;  %s1826_s0 = inlined_call_operand.vmem [shape: f32[2,512], index: 0, kind: input, shape index: {}]   ;;  %s1827_s1 = inlined_call_operand.vmem [shape: f32[512,32], index: 1, kind: input, shape index: {}]   ;;  %s1828_s2 = inlined_call_operand.vmem [shape: f32[1,32], index: 2, kind: input, shape index: {}]   ;;  %s1829_s3 = inlined_call_operand.vmem [shape: f32[512,32], index: 3, kind: input, shape index: {}]   ;;  %s1830_s4 = inlined_call_operand.vmem [shape: f32[1,32], index: 4, kind: input, shape index: {}]   ;;  %s1831_s5 = inlined_call_operand.vmem [shape: f32[32,1024], index: 5, kind: input, shape index: {}]   ;;  %s1832_s6 = inlined_call_operand.vmem [shape: f32[1,1024], index: 6, kind: input, shape index: {}]   ;;  %s1833_s7 = inlined_call_operand.vmem [shape: f32[2,32], index: 7, kind: input, shape index: {}]   ;;  %s1834_s8 = inlined_call_operand.hbm [shape: f32[2,32], index: 8, kind: output, shape index: {0}]   ;;  %s1835_s9 = inlined_call_operand.hbm [shape: f32[2,32], index: 9, kind: output, shape index: {1}]   ;;  %s1836_s10 = inlined_call_operand.vmem [shape: f32[2,1024], index: 10, kind: output, shape index: {2}]  }
   0x1   :  { %v66_v0 = vld [vmem:[%s1827_s1 + $0xf8] sm:$0xff]  ;;  %v65_v4 = vld [vmem:[%s1827_s1 + $0xf0] sm:$0xff]  ;;  %v64_v8 = vld [vmem:[%s1827_s1 + $0xe8] sm:$0xff]  ;;  %v109_v31 = vunpack.c.l.s4 %v1213_v30 }
   0x2   :  { %v98_v1 = vld [vmem:[%s1827_s1 + $0x1f8] sm:$0xff]  ;;  %990 = vmatprep.subr.mxu0 %v66_v0  ;;  %v97_v5 = vld [vmem:[%s1827_s1 + $0x1f0] sm:$0xff]  ;;  %v96_v9 = vld [vmem:[%s1827_s1 + $0x1e8] sm:$0xff]  ;;  %v1386_v42 = vshrl.u32 %v111_v32, 7 }
   0x3   :  { %v50_v2 = vld [vmem:[%s1827_s1 + $0x78] sm:$0xff]  ;;  %1025 = vmatprep.subr.mxu1 %v98_v1  ;;  %v49_v6 = vld [vmem:[%s1827_s1 + $0x70] sm:$0xff]  ;;  %v48_v10 = vld [vmem:[%s1827_s1 + $0x68] sm:$0xff]  ;;  %v110_v41 = vunpack.c.0.s8 %v109_v31 }
   0x4   :  { %v82_v3 = vld [vmem:[%s1827_s1 + $0x178] sm:$0xff]  ;;  %991 = vmatpush3.msra.mxu0 %v50_v2  ;;  %v81_v7 = vld [vmem:[%s1827_s1 + $0x170] sm:$0xff]  ;;  %v80_v11 = vld [vmem:[%s1827_s1 + $0x168] sm:$0xff] }
   0x5   :  { %1026 = vmatpush3.msra.mxu1 %v82_v3  ;;  %992 = vmatprep.subr.mxu0 %v65_v4  ;;  %v63_v12 = vld [vmem:[%s1827_s1 + $0xe0] sm:$0xff]  ;;  %v62_v16 = vld [vmem:[%s1827_s1 + $0xd8] sm:$0xff]  ;;  %v61_v20 = vld [vmem:[%s1827_s1 + $0xd0] sm:$0xff]  ;;  %v1413_v51 = vsub.s32 %v110_v41, %v1386_v42 }
   0x6   :  { %1027 = vmatprep.subr.mxu1 %v97_v5  ;;  %993 = vmatpush3.msra.mxu0 %v49_v6  ;;  %v95_v13 = vld [vmem:[%s1827_s1 + $0x1e0] sm:$0xff]  ;;  %v94_v17 = vld [vmem:[%s1827_s1 + $0x1d8] sm:$0xff]  ;;  %v93_v21 = vld [vmem:[%s1827_s1 + $0x1d0] sm:$0xff] }
   0x7   :  { %1028 = vmatpush3.msra.mxu1 %v81_v7  ;;  %994 = vmatprep.subr.mxu0 %v64_v8  ;;  %v47_v14 = vld [vmem:[%s1827_s1 + $0x60] sm:$0xff]  ;;  %v46_v18 = vld [vmem:[%s1827_s1 + $0x58] sm:$0xff]  ;;  %v45_v22 = vld [vmem:[%s1827_s1 + $0x50] sm:$0xff] }
   0x8   :  { %1029 = vmatprep.subr.mxu1 %v96_v9  ;;  %v79_v15 = vld [vmem:[%s1827_s1 + $0x160] sm:$0xff]  ;;  %995 = vmatpush3.msra.mxu0 %v48_v10  ;;  %v78_v19 = vld [vmem:[%s1827_s1 + $0x158] sm:$0xff]  ;;  %v77_v23 = vld [vmem:[%s1827_s1 + $0x150] sm:$0xff] }
   0x9   :  { %1030 = vmatpush3.msra.mxu1 %v80_v11  ;;  %996 = vmatprep.subr.mxu0 %v63_v12  ;;  %v60_v24 = vld [vmem:[%s1827_s1 + $0xc8] sm:$0xff]  ;;  %v59_v28 = vld [vmem:[%s1827_s1 + $0xc0] sm:$0xff]  ;;  %v58_v35 = vld [vmem:[%s1827_s1 + $0xb8] sm:$0xff] }
   0xa   :  { %1031 = vmatprep.subr.mxu1 %v95_v13  ;;  %997 = vmatpush3.msra.mxu0 %v47_v14  ;;  %v92_v25 = vld [vmem:[%s1827_s1 + $0x1c8] sm:$0xff]  ;;  %v91_v29 = vld [vmem:[%s1827_s1 + $0x1c0] sm:$0xff]  ;;  %v90_v36 = vld [vmem:[%s1827_s1 + $0x1b8] sm:$0xff] }
   0xb   :  { %1032 = vmatpush3.msra.mxu1 %v79_v15  ;;  %998 = vmatprep.subr.mxu0 %v62_v16  ;;  %v44_v26 = vld [vmem:[%s1827_s1 + $0x48] sm:$0xff]  ;;  %v43_v33 = vld [vmem:[%s1827_s1 + $0x40] sm:$0xff]  ;;  %v42_v37 = vld [vmem:[%s1827_s1 + $0x38] sm:$0xff] }
   0xc   :  { %1033 = vmatprep.subr.mxu1 %v94_v17  ;;  %999 = vmatpush3.msra.mxu0 %v46_v18  ;;  %v76_v27 = vld [vmem:[%s1827_s1 + $0x148] sm:$0xff]  ;;  %v75_v34 = vld [vmem:[%s1827_s1 + $0x140] sm:$0xff]  ;;  %v74_v38 = vld [vmem:[%s1827_s1 + $0x138] sm:$0xff] }
   0xd   :  { %1034 = vmatpush3.msra.mxu1 %v78_v19  ;;  %1000 = vmatprep.subr.mxu0 %v61_v20  ;;  %v57_v39 = vld [vmem:[%s1827_s1 + $0xb0] sm:$0xff]  ;;  %v56_v45 = vld [vmem:[%s1827_s1 + $0xa8] sm:$0xff]  ;;  %v55_v49 = vld [vmem:[%s1827_s1 + $0xa0] sm:$0xff] }
   0xe   :  { %1035 = vmatprep.subr.mxu1 %v93_v21  ;;  %1001 = vmatpush3.msra.mxu0 %v45_v22  ;;  %v89_v40 = vld [vmem:[%s1827_s1 + $0x1b0] sm:$0xff]  ;;  %v88_v46 = vld [vmem:[%s1827_s1 + $0x1a8] sm:$0xff]  ;;  %v87_v50 = vld [vmem:[%s1827_s1 + $0x1a0] sm:$0xff] }
   0xf   :  { %1036 = vmatpush3.msra.mxu1 %v77_v23  ;;  %1002 = vmatprep.subr.mxu0 %v60_v24  ;;  %v41_v43 = vld [vmem:[%s1827_s1 + $0x30] sm:$0xff]  ;;  %v40_v47 = vld [vmem:[%s1827_s1 + $0x28] sm:$0xff]  ;;  %v39_v52 = vld [vmem:[%s1827_s1 + $0x20] sm:$0xff] }
  0x10   :  { %1037 = vmatprep.subr.mxu1 %v92_v25  ;;  %1003 = vmatpush3.msra.mxu0 %v44_v26  ;;  %v73_v44 = vld [vmem:[%s1827_s1 + $0x130] sm:$0xff]  ;;  %v72_v48 = vld [vmem:[%s1827_s1 + $0x128] sm:$0xff]  ;;  %v71_v53 = vld [vmem:[%s1827_s1 + $0x120] sm:$0xff] }
  0x11   :  { %1038 = vmatpush3.msra.mxu1 %v76_v27  ;;  %1004 = vmatprep.subr.mxu0 %v59_v28  ;;  %v34_v54 = vld [vmem:[%s1826_s0] sm:$0xff]  ;;  %v54_v55 = vld [vmem:[%s1827_s1 + $0x98] sm:$0xff]  ;;  %v53_v60 = vld [vmem:[%s1827_s1 + $0x90] sm:$0xff] }
  0x12   :  { %1039 = vmatprep.subr.mxu1 %v91_v29  ;;  %1005 = vmatpush3.msra.mxu0 %v43_v33  ;;  %v86_v56 = vld [vmem:[%s1827_s1 + $0x198] sm:$0xff]  ;;  %v107_v57 = vcombine.high %v34_v54, %v34_v54  ;;  %v85_v61 = vld [vmem:[%s1827_s1 + $0x190] sm:$0xff]  ;;  %v1443_v62 = vrot.slane %v34_v54, %v1413_v51  ;;  %v52_v1 = vld [vmem:[%s1827_s1 + $0x88] sm:$0xff] }
  0x13   :  { %1040 = vmatpush3.msra.mxu1 %v75_v34  ;;  %1006 = vmatprep.subr.mxu0 %v58_v35  ;;  %v38_v58 = vld [vmem:[%s1827_s1 + $0x18] sm:$0xff]  ;;  %v37_v63 = vld [vmem:[%s1827_s1 + $0x10] sm:$0xff]  ;;  %v84_v2 = vld [vmem:[%s1827_s1 + $0x188] sm:$0xff] }
  0x14   :  { %1041 = vmatprep.subr.mxu1 %v90_v36  ;;  %1007 = vmatpush3.msra.mxu0 %v42_v37  ;;  %v70_v59 = vld [vmem:[%s1827_s1 + $0x118] sm:$0xff]  ;;  %v69_v0 = vld [vmem:[%s1827_s1 + $0x110] sm:$0xff]  ;;  %v1458_v3 = vrot.slane %v107_v57, %v1413_v51  ;;  %v36_v4 = vld [vmem:[%s1827_s1 + $0x8] sm:$0xff]  ;;  %v1474_v8 = vcombine.high %v1443_v62, %v1443_v62 }
  0x15   :  { %1042 = vmatpush3.msra.mxu1 %v74_v38  ;;  %1008 = vmatprep.subr.mxu0 %v57_v39  ;;  %v68_v5 = vld [vmem:[%s1827_s1 + $0x108] sm:$0xff]  ;;  %v51_v6 = vld [vmem:[%s1827_s1 + $0x80] sm:$0xff]  ;;  %v299_v12 = vld [vmem:[%s1829_s3 + $0xf8] sm:$0xff] }
  0x16   :  { %1043 = vmatprep.subr.mxu1 %v89_v40  ;;  %1009 = vmatpush3.msra.mxu0 %v41_v43  ;;  %v83_v7 = vld [vmem:[%s1827_s1 + $0x180] sm:$0xff]  ;;  %v1484_v11 = vcombine.high %v1458_v3, %v1458_v3  ;;  %v331_v13 = vld [vmem:[%s1829_s3 + $0x1f8] sm:$0xff]  ;;  %v298_v16 = vld [vmem:[%s1829_s3 + $0xf0] sm:$0xff] }
  0x17   :  { %1044 = vmatpush3.msra.mxu1 %v73_v44  ;;  %1010 = vmatprep.subr.mxu0 %v56_v45  ;;  %v35_v9 = vld [vmem:[%s1827_s1] sm:$0xff]  ;;  %v283_v14 = vld [vmem:[%s1829_s3 + $0x78] sm:$0xff]  ;;  %v330_v17 = vld [vmem:[%s1829_s3 + $0x1f0] sm:$0xff] }
  0x18   :  { %1045 = vmatprep.subr.mxu1 %v88_v46  ;;  %1011 = vmatpush3.msra.mxu0 %v40_v47  ;;  %v67_v10 = vld [vmem:[%s1827_s1 + $0x100] sm:$0xff]  ;;  %v315_v15 = vld [vmem:[%s1829_s3 + $0x178] sm:$0xff]  ;;  %v282_v18 = vld [vmem:[%s1829_s3 + $0x70] sm:$0xff] }
  0x19   :  { %1046 = vmatpush3.msra.mxu1 %v72_v48  ;;  %1012 = vmatprep.subr.mxu0 %v55_v49  ;;  %v314_v19 = vld [vmem:[%s1829_s3 + $0x170] sm:$0xff]  ;;  %v297_v20 = vld [vmem:[%s1829_s3 + $0xe8] sm:$0xff]  ;;  %v296_v24 = vld [vmem:[%s1829_s3 + $0xe0] sm:$0xff] }
  0x1a   :  { %1047 = vmatprep.subr.mxu1 %v87_v50  ;;  %1013 = vmatpush3.msra.mxu0 %v39_v52  ;;  %v329_v21 = vld [vmem:[%s1829_s3 + $0x1e8] sm:$0xff]  ;;  %v328_v25 = vld [vmem:[%s1829_s3 + $0x1e0] sm:$0xff]  ;;  %v295_v28 = vld [vmem:[%s1829_s3 + $0xd8] sm:$0xff] }
  0x1b   :  { %1048 = vmatpush3.msra.mxu1 %v71_v53  ;;  %1014 = vmatprep.subr.mxu0 %v54_v55  ;;  %v281_v22 = vld [vmem:[%s1829_s3 + $0x68] sm:$0xff]  ;;  %v280_v26 = vld [vmem:[%s1829_s3 + $0x60] sm:$0xff]  ;;  %v327_v29 = vld [vmem:[%s1829_s3 + $0x1d8] sm:$0xff] }
  0x1c   :  { %1049 = vmatprep.subr.mxu1 %v86_v56  ;;  %1015 = vmatpush3.msra.mxu0 %v38_v58  ;;  %v313_v23 = vld [vmem:[%s1829_s3 + $0x168] sm:$0xff]  ;;  %v312_v27 = vld [vmem:[%s1829_s3 + $0x160] sm:$0xff]  ;;  %v279_v30 = vld [vmem:[%s1829_s3 + $0x58] sm:$0xff] }
  0x1d   :  { %1050 = vmatpush3.msra.mxu1 %v70_v59  ;;  %1016 = vmatprep.subr.mxu0 %v53_v60  ;;  %v311_v31 = vld [vmem:[%s1829_s3 + $0x158] sm:$0xff]  ;;  %v294_v32 = vld [vmem:[%s1829_s3 + $0xd0] sm:$0xff] }
  0x1e   :  { %1051 = vmatprep.subr.mxu1 %v85_v61  ;;  %1017 = vmatpush3.msra.mxu0 %v37_v63  ;;  %v326_v33 = vld [vmem:[%s1829_s3 + $0x1d0] sm:$0xff] }
  0x1f   :  { %1052 = vmatpush3.msra.mxu1 %v69_v0  ;;  %1018 = vmatprep.subr.mxu0 %v52_v1  ;;  %v278_v34 = vld [vmem:[%s1829_s3 + $0x50] sm:$0xff] }
  0x20   :  { %1053 = vmatprep.subr.mxu1 %v84_v2  ;;  %1019 = vmatpush3.msra.mxu0 %v36_v4  ;;  %v310_v35 = vld [vmem:[%s1829_s3 + $0x150] sm:$0xff] }
  0x21   :  { %1054 = vmatpush3.msra.mxu1 %v68_v5  ;;  %1020 = vmatprep.subr.mxu0 %v51_v6 }
  0x22   :  { %1055 = vmatprep.subr.mxu1 %v83_v7  ;;  %1021 = vmatpush3.msra.mxu0 %v35_v9 }
  0x23   :  { %192 = vmatprep.mubr.f32.mxu0 %v1474_v8  ;;  %1056 = vmatpush3.msra.mxu1 %v67_v10 }
  0x24   :  { %193 = vmatmul.mubr.f32.vlgmr.msra.gmra.mxu0 %v1443_v62  ;;  %262 = vmatprep.mubr.f32.mxu1 %v1484_v11 }
  0x25   :  { %1060 = vmatprep.subr.mxu0 %v299_v12  ;;  %1095 = vmatprep.subr.mxu1 %v331_v13 }
  0x26   :  { %263 = vmatmul.mubr.f32.vlgmr.msra.gmra.mxu1 %v1458_v3  ;;  %1061 = vmatpush3.msra.mxu0 %v283_v14 }
  0x27   :  { %1096 = vmatpush3.msra.mxu1 %v315_v15  ;;  %1062 = vmatprep.subr.mxu0 %v298_v16 }
  0x28   :  { %1097 = vmatprep.subr.mxu1 %v330_v17  ;;  %1063 = vmatpush3.msra.mxu0 %v282_v18 }
  0x29   :  { %1098 = vmatpush3.msra.mxu1 %v314_v19  ;;  %1064 = vmatprep.subr.mxu0 %v297_v20 }
  0x2a   :  { %1099 = vmatprep.subr.mxu1 %v329_v21  ;;  %1065 = vmatpush3.msra.mxu0 %v281_v22 }
  0x2b   :  { %1100 = vmatpush3.msra.mxu1 %v313_v23  ;;  %1066 = vmatprep.subr.mxu0 %v296_v24 }
  0x2c   :  { %1101 = vmatprep.subr.mxu1 %v328_v25  ;;  %1067 = vmatpush3.msra.mxu0 %v280_v26 }
  0x2d   :  { %1102 = vmatpush3.msra.mxu1 %v312_v27  ;;  %1068 = vmatprep.subr.mxu0 %v295_v28 }
  0x2e   :  { %1103 = vmatprep.subr.mxu1 %v327_v29 }
  0x2f   :  { %17 = vsyncpa [#allocation5], 0  ;;  %1069 = vmatpush3.msra.mxu0 %v279_v30  ;;  %1104 = vmatpush3.msra.mxu1 %v311_v31  ;;  %v293_v36 = vld [vmem:[%s1829_s3 + $0xc8] sm:$0xff]  ;;  %v292_v40 = vld [vmem:[%s1829_s3 + $0xc0] sm:$0xff]  ;;  %vm895_vm0 = vcmask 254976   ;;  %vm559_vm1 = vcmask 261120  }
  0x30   :  { %v325_v37 = vld [vmem:[%s1829_s3 + $0x1c8] sm:$0xff]  ;;  %1070 = vmatprep.subr.mxu0 %v294_v32  ;;  %1105 = vmatprep.subr.mxu1 %v326_v33  ;;  %v324_v41 = vld [vmem:[%s1829_s3 + $0x1c0] sm:$0xff]  ;;  %v291_v45 = vld [vmem:[%s1829_s3 + $0xb8] sm:$0xff]  ;;  %v1214_v32 = vmov 0.0   ;;  %s1215_s14 = smov [#allocation2]   ;;  %s1216_s16 = smov [#allocation4]  }
  0x31   :  { %v277_v38 = vld [vmem:[%s1829_s3 + $0x48] sm:$0xff]  ;;  %1071 = vmatpush3.msra.mxu0 %v278_v34  ;;  %1106 = vmatpush3.msra.mxu1 %v310_v35  ;;  %v276_v43 = vld [vmem:[%s1829_s3 + $0x40] sm:$0xff]  ;;  %v323_v46 = vld [vmem:[%s1829_s3 + $0x1b8] sm:$0xff]  ;;  %s950_s15 = sshll.u32 %s1215_s14, 4  ;;  %s960_s17 = sshll.u32 %s1216_s16, 4  ;;  %s951_s15 = int_to_ptr.vmem [resolvable:$true] %s950_s15  ;;  %s961_s17 = int_to_ptr.vmem [resolvable:$true] %s960_s17 }
  0x32   :  { %v309_v39 = vld [vmem:[%s1829_s3 + $0x148] sm:$0xff]  ;;  %1072 = vmatprep.subr.mxu0 %v293_v36  ;;  %1107 = vmatprep.subr.mxu1 %v325_v37  ;;  %v308_v44 = vld [vmem:[%s1829_s3 + $0x140] sm:$0xff]  ;;  %v275_v47 = vld [vmem:[%s1829_s3 + $0x38] sm:$0xff]  ;;  %s1169_s18 = scalar_lea.vmem %s951_s15, 32  ;;  %p1174_p1 = scmp.lt.s32.totalorder %s951_s15, %s951_s15 }
  0x33   :  { %1073 = vmatpush3.msra.mxu0 %v277_v38  ;;  %1108 = vmatpush3.msra.mxu1 %v309_v39  ;;  %v307_v48 = vld [vmem:[%s1829_s3 + $0x138] sm:$0xff]  ;;  %v290_v49 = vld [vmem:[%s1829_s3 + $0xb0] sm:$0xff]  ;;  %v289_v54 = vld [vmem:[%s1829_s3 + $0xa8] sm:$0xff]  ;;  %p1170_p0 = scmp.ne.s32.totalorder %s951_s15, %s1169_s18  ;;  %p1175_p2 = scmp.lt.s32.totalorder %s1169_s18, %s1169_s18 }
  0x34   :  { %1074 = vmatprep.subr.mxu0 %v292_v40  ;;  %1109 = vmatprep.subr.mxu1 %v324_v41  ;;  %v322_v50 = vld [vmem:[%s1829_s3 + $0x1b0] sm:$0xff]  ;;  %v321_v55 = vld [vmem:[%s1829_s3 + $0x1a8] sm:$0xff]  ;;  %v288_v58 = vld [vmem:[%s1829_s3 + $0xa0] sm:$0xff] }
  0x35   :  { %1075 = vmatpush3.msra.mxu0 %v276_v43  ;;  %1110 = vmatpush3.msra.mxu1 %v308_v44  ;;  %v274_v52 = vld [vmem:[%s1829_s3 + $0x30] sm:$0xff]  ;;  %v273_v56 = vld [vmem:[%s1829_s3 + $0x28] sm:$0xff]  ;;  %v320_v59 = vld [vmem:[%s1829_s3 + $0x1a0] sm:$0xff]  ;;  %p1176_p3 = por %p1175_p2, %p1174_p1 }
  0x36   :  { %1076 = vmatprep.subr.mxu0 %v291_v45  ;;  %1111 = vmatprep.subr.mxu1 %v323_v46  ;;  %v306_v53 = vld [vmem:[%s1829_s3 + $0x130] sm:$0xff]  ;;  %v305_v57 = vld [vmem:[%s1829_s3 + $0x128] sm:$0xff]  ;;  %v272_v60 = vld [vmem:[%s1829_s3 + $0x20] sm:$0xff] }
  0x37   :  { %1077 = vmatpush3.msra.mxu0 %v275_v47  ;;  %1112 = vmatpush3.msra.mxu1 %v307_v48  ;;  %v304_v61 = vld [vmem:[%s1829_s3 + $0x120] sm:$0xff]  ;;  %v287_v63 = vld [vmem:[%s1829_s3 + $0x98] sm:$0xff]  ;;  %v286_v4 = vld [vmem:[%s1829_s3 + $0x90] sm:$0xff]  ;;  %p1177_p4 = pnand %p1176_p3, %p1170_p0 }
  0x38   :  { %1078 = vmatprep.subr.mxu0 %v290_v49  ;;  %1113 = vmatprep.subr.mxu1 %v322_v50  ;;  %v319_v0 = vld [vmem:[%s1829_s3 + $0x198] sm:$0xff]  ;;  %v318_v5 = vld [vmem:[%s1829_s3 + $0x190] sm:$0xff]  ;;  %v285_v9 = vld [vmem:[%s1829_s3 + $0x88] sm:$0xff] }
  0x39   :  { %1079 = vmatpush3.msra.mxu0 %v274_v52  ;;  %1114 = vmatpush3.msra.mxu1 %v306_v53  ;;  %v271_v1 = vld [vmem:[%s1829_s3 + $0x18] sm:$0xff]  ;;  %v270_v6 = vld [vmem:[%s1829_s3 + $0x10] sm:$0xff]  ;;  %v317_v10 = vld [vmem:[%s1829_s3 + $0x188] sm:$0xff] }
  0x3a   :  { %1080 = vmatprep.subr.mxu0 %v289_v54  ;;  %1115 = vmatprep.subr.mxu1 %v321_v55  ;;  %v303_v2 = vld [vmem:[%s1829_s3 + $0x118] sm:$0xff]  ;;  %v302_v7 = vld [vmem:[%s1829_s3 + $0x110] sm:$0xff]  ;;  %v269_v12 = vld [vmem:[%s1829_s3 + $0x8] sm:$0xff] }
  0x3b   :  { %1081 = vmatpush3.msra.mxu0 %v273_v56  ;;  %1116 = vmatpush3.msra.mxu1 %v305_v57  ;;  %v301_v13 = vld [vmem:[%s1829_s3 + $0x108] sm:$0xff]  ;;  %v284_v14 = vld [vmem:[%s1829_s3 + $0x80] sm:$0xff]  ;;  %v512_v19 = vld [vmem:[%s1831_s5 + $0xd8] sm:$0xff] }
  0x3c   :  { %1082 = vmatprep.subr.mxu0 %v288_v58  ;;  %1117 = vmatprep.subr.mxu1 %v320_v59  ;;  %v316_v15 = vld [vmem:[%s1829_s3 + $0x180] sm:$0xff]  ;;  %v510_v18 = vld [vmem:[%s1831_s5 + $0xc8] sm:$0xff]  ;;  %v503_v21 = vld [vmem:[%s1831_s5 + $0x90] sm:$0xff] }
  0x3d   :  { %1083 = vmatpush3.msra.mxu0 %v272_v60  ;;  %1118 = vmatpush3.msra.mxu1 %v304_v61  ;;  %v268_v16 = vld [vmem:[%s1829_s3] sm:$0xff]  ;;  %v494_v22 = vld [vmem:[%s1831_s5 + $0x48] sm:$0xff]  ;;  %v496_v23 = vld [vmem:[%s1831_s5 + $0x58] sm:$0xff] }
  0x3e   :  { %1084 = vmatprep.subr.mxu0 %v287_v63  ;;  %1119 = vmatprep.subr.mxu1 %v319_v0  ;;  %v300_v17 = vld [vmem:[%s1829_s3 + $0x100] sm:$0xff]  ;;  %v495_v25 = vld [vmem:[%s1831_s5 + $0x50] sm:$0xff]  ;;  %v486_v26 = vld [vmem:[%s1831_s5 + $0x8] sm:$0xff] }
  0x3f   :  { %1085 = vmatpush3.msra.mxu0 %v271_v1  ;;  %1120 = vmatpush3.msra.mxu1 %v303_v2  ;;  %v509_v20 = vld [vmem:[%s1831_s5 + $0xc0] sm:$0xff]  ;;  %v488_v27 = vld [vmem:[%s1831_s5 + $0x18] sm:$0xff]  ;;  %v487_v29 = vld [vmem:[%s1831_s5 + $0x10] sm:$0xff] }
  0x40   :  { %1086 = vmatprep.subr.mxu0 %v286_v4  ;;  %1121 = vmatprep.subr.mxu1 %v318_v5  ;;  %v493_v24 = vld [vmem:[%s1831_s5 + $0x40] sm:$0xff]  ;;  %v514_v30 = vld [vmem:[%s1831_s5 + $0xe8] sm:$0xff]  ;;  %v516_v31 = vld [vmem:[%s1831_s5 + $0xf8] sm:$0xff] }
  0x41   :  { %1087 = vmatpush3.msra.mxu0 %v270_v6  ;;  %1122 = vmatpush3.msra.mxu1 %v302_v7  ;;  %v485_v28 = vld [vmem:[%s1831_s5] sm:$0xff]  ;;  %v515_v60 = vld [vmem:[%s1831_s5 + $0xf0] sm:$0xff]  ;;  %v506_v61 = vld [vmem:[%s1831_s5 + $0xa8] sm:$0xff] }
  0x42   :  { %1088 = vmatprep.subr.mxu0 %v285_v9  ;;  %1123 = vmatprep.subr.mxu1 %v317_v10  ;;  %v976_v35 = vld [vmem:[%s1828_s2] ss:$0 sm:$0xff]  ;;  %v508_v63 = vld [vmem:[%s1831_s5 + $0xb8] sm:$0xff]  ;;  %v507_v1 = vld [vmem:[%s1831_s5 + $0xb0] sm:$0xff] }
  0x43   :  { %1089 = vmatpush3.msra.mxu0 %v269_v12  ;;  %1124 = vmatpush3.msra.mxu1 %v301_v13  ;;  %v977_v45 = vld [vmem:[%s1830_s4] ss:$0 sm:$0xff]  ;;  %v498_v2 = vld [vmem:[%s1831_s5 + $0x68] sm:$0xff]  ;;  %v500_v4 = vld [vmem:[%s1831_s5 + $0x78] sm:$0xff] }
  0x44   :  { %1090 = vmatprep.subr.mxu0 %v284_v14  ;;  %1125 = vmatprep.subr.mxu1 %v316_v15  ;;  %v482_v55 = vld [vmem:[%s1833_s7] sm:$0x3]  ;;  %v499_v6 = vld [vmem:[%s1831_s5 + $0x70] sm:$0xff]  ;;  %v490_v7 = vld [vmem:[%s1831_s5 + $0x28] sm:$0xff] }
  0x45   :  { %1091 = vmatpush3.msra.mxu0 %v268_v16  ;;  %403 = vmatprep.mubr.f32.mxu0 %v1474_v8  ;;  %v504_v8 = vld [vmem:[%s1831_s5 + $0x98] sm:$0xff]  ;;  %v513_v59 = vld [vmem:[%s1831_s5 + $0xe0] sm:$0xff]  ;;  %v491_v12 = vld [vmem:[%s1831_s5 + $0x30] sm:$0xff] }
  0x46   :  { %1126 = vmatpush3.msra.mxu1 %v300_v17  ;;  %473 = vmatprep.mubr.f32.mxu1 %v1484_v11  ;;  %v501_v11 = vld [vmem:[%s1831_s5 + $0x80] sm:$0xff]  ;;  %v492_v9 = vld [vmem:[%s1831_s5 + $0x38] sm:$0xff] }
  0x47   :  { %404 = vmatmul.mubr.f32.vlgmr.msra.gmra.mxu0 %v1443_v62  ;;  %474 = vmatmul.mubr.f32.vlgmr.msra.gmra.mxu1 %v1458_v3  ;;  %v511_v62 = vld [vmem:[%s1831_s5 + $0xd0] sm:$0xff]  ;;  %v502_v3 = vld [vmem:[%s1831_s5 + $0x88] sm:$0xff]  ;;  %v505_v0 = vld [vmem:[%s1831_s5 + $0xa0] sm:$0xff] }
  0x48   :  { %587 = vmatprep.subr.mxu0 %v510_v18  ;;  %658 = vmatprep.subr.mxu1 %v512_v19  ;;  %v497_v5 = vld [vmem:[%s1831_s5 + $0x60] sm:$0xff] }
  0x49   :  { %588 = vmatpush1.msra.mxu0 %v509_v20  ;;  %659 = vmatpush1.msra.mxu1 %v511_v62  ;;  %v489_v10 = vld [vmem:[%s1831_s5 + $0x20] sm:$0xff] }
  0x4a   :  { %589 = vmatprep.subr.mxu0 %v502_v3  ;;  %660 = vmatprep.subr.mxu1 %v504_v8 }
  0x4b   :  { %590 = vmatpush1.msra.mxu0 %v501_v11  ;;  %661 = vmatpush1.msra.mxu1 %v503_v21 }
  0x4c   :  { %591 = vmatprep.subr.mxu0 %v494_v22  ;;  %662 = vmatprep.subr.mxu1 %v496_v23 }
  0x4d   :  { %592 = vmatpush1.msra.mxu0 %v493_v24  ;;  %663 = vmatpush1.msra.mxu1 %v495_v25 }
  0x4e   :  { %593 = vmatprep.subr.mxu0 %v486_v26  ;;  %664 = vmatprep.subr.mxu1 %v488_v27 }
  0x4f   :  { %594 = vmatpush1.msra.mxu0 %v485_v28  ;;  %665 = vmatpush1.msra.mxu1 %v487_v29 }
  0x50   :  { %627 = vmatprep.mubr.f32.mxu0 %v1214_v32  ;;  %698 = vmatprep.mubr.f32.mxu1 %v1214_v32 }
  0x51   :  { %729 = vmatprep.subr.mxu0 %v514_v30  ;;  %800 = vmatprep.subr.mxu1 %v516_v31 }
  0xe4   :  { %v1022_v33 = vpop.f32.mrf.mxu0 }
  0xe6   :  { %v1057_v34 = vpop.f32.mrf.mxu1  ;;  %v1023_v36 = vpop.f32.mrf.mxu0 }
  0xe7   :  { %v1024_v37 = vadd.f32 %v1023_v36, %v1022_v33 }
  0xe8   :  { %v1058_v38 = vpop.f32.mrf.mxu1 }
  0xe9   :  { %v195_v39 = vadd.f32 %v1024_v37, %v976_v35  ;;  %v1059_v40 = vadd.f32 %v1058_v38, %v1057_v34 }
  0xeb   :  { %v265_v41 = vadd.f32 %v1059_v40, %v195_v39 }
  0xed   :  { %896 = vst.msk [vmem:[#allocation2] sm:$0x3] %vm895_vm0, %v265_v41 }
 0x107   :  { %v1092_v43 = vpop.f32.mrf.mxu0  ;;  %v1127_v44 = vpop.f32.mrf.mxu1 }
 0x109   :  { %v1093_v46 = vpop.f32.mrf.mxu0  ;;  %v1128_v47 = vpop.f32.mrf.mxu1 }
 0x10a   :  { %v1094_v48 = vadd.f32 %v1093_v46, %v1092_v43  ;;  %v1129_v50 = vadd.f32 %v1128_v47, %v1127_v44 }
 0x10c   :  { %v406_v49 = vadd.f32 %v1094_v48, %v977_v45 }
 0x10e   :  { %v476_v52 = vadd.f32 %v1129_v50, %v406_v49 }
 0x110   :  { %v479_v53 = vmul.f32 0.5, %v476_v52  ;;  %897 = vst.msk [vmem:[#allocation4] sm:$0x3] %vm895_vm0, %v476_v52 }
 0x112   :  { %v480_v54 = vmul.f32 1.442695, %v479_v53 }
 0x114   :  { %1135 = vpow2.f32 %v480_v54 }
 0x121   :  { %v1136_v56 = vpop.eup %1135 }
 0x122   :  { %v483_v57 = vmul.f32 %v1136_v56, %v482_v55 }
 0x124   :  { %v484_v58 = vadd.f32 %v483_v57, %v265_v41 }
 0x126   :  { %978 = vmatmul.mubr.msk.f32.vlgmr.msra.gmra.mxu0 %vm559_vm1, %v484_v58  ;;  %979 = vmatmul.mubr.msk.f32.vlgmr.msra.gmra.mxu1 %vm559_vm1, %v484_v58 }
 0x127   :  { %730 = vmatpush1.msra.mxu0 %v513_v59  ;;  %801 = vmatpush1.msra.mxu1 %v515_v60 }
 0x128   :  { %731 = vmatprep.subr.mxu0 %v506_v61  ;;  %802 = vmatprep.subr.mxu1 %v508_v63 }
 0x129   :  { %732 = vmatpush1.msra.mxu0 %v505_v0  ;;  %803 = vmatpush1.msra.mxu1 %v507_v1 }
 0x12a   :  { %733 = vmatprep.subr.mxu0 %v498_v2  ;;  %804 = vmatprep.subr.mxu1 %v500_v4 }
 0x12b   :  { %734 = vmatpush1.msra.mxu0 %v497_v5  ;;  %805 = vmatpush1.msra.mxu1 %v499_v6 }
 0x12c   :  { %735 = vmatprep.subr.mxu0 %v490_v7  ;;  %806 = vmatprep.subr.mxu1 %v492_v9 }
 0x12d   :  { %736 = vmatpush1.msra.mxu0 %v489_v10  ;;  %769 = vmatprep.mubr.f32.mxu0 %v1214_v32 }
 0x12e   :  { %807 = vmatpush1.msra.mxu1 %v491_v12  ;;  %840 = vmatprep.mubr.f32.mxu1 %v1214_v32 }
 0x12f   :  { %980 = vmatmul.mubr.msk.f32.vlgmr.msra.gmra.mxu0 %vm559_vm1, %v484_v58  ;;  %981 = vmatmul.mubr.msk.f32.vlgmr.msra.gmra.mxu1 %vm559_vm1, %v484_v58 }
 0x130   :  { %1180 = shalt.err (!%p1177_p4)
}
 0x131   :  { %953 = dma.vmem_to_hbm [thread:$0]  %s951_s15, 32, %s1834_s8, [#allocation3]  }
 0x132   :  { %s1189_s7 = scalar_lea.vmem %s961_s17, 32  ;;  %p1194_p6 = scmp.lt.s32.totalorder %s961_s17, %s961_s17 }
 0x133   :  { %p1190_p5 = scmp.ne.s32.totalorder %s961_s17, %s1189_s7  ;;  %p1195_p7 = scmp.lt.s32.totalorder %s1189_s7, %s1189_s7 }
 0x135   :  { %p1196_p8 = por %p1195_p7, %p1194_p6 }
 0x137   :  { %p1197_p9 = pnand %p1196_p8, %p1190_p5 }
 0x139   :  { %1200 = shalt.err (!%p1197_p9)
}
 0x13a   :  { %963 = dma.vmem_to_hbm [thread:$0]  %s961_s17, 32, %s1835_s9, [#allocation5]   ;;  %v521_v13 = vsub.s32 0, %v1386_v42  ;;  %v529_v14 = vsub.s32 2, %v1386_v42  ;;  %v517_v15 = vld [vmem:[%s1832_s6] sm:$0xff]  ;;  %v525_v16 = vsub.s32 1, %v1386_v42 }
 0x13b   :  { %v533_v17 = vsub.s32 3, %v1386_v42  ;;  %v537_v24 = vsub.s32 4, %v1386_v42  ;;  %v545_v25 = vsub.s32 6, %v1386_v42  ;;  %v541_v30 = vsub.s32 5, %v1386_v42 }
 0x13c   :  { %v522_v18 = vrot.slane %v517_v15, %v521_v13  ;;  %v530_v19 = vrot.slane %v517_v15, %v529_v14  ;;  %v526_v20 = vrot.slane %v517_v15, %v525_v16  ;;  %v549_v31 = vsub.s32 7, %v1386_v42 }
 0x13d   :  { %v534_v62 = vrot.slane %v517_v15, %v533_v17  ;;  %v538_v34 = vrot.slane %v517_v15, %v537_v24  ;;  %v546_v35 = vrot.slane %v517_v15, %v545_v25  ;;  %v542_v36 = vrot.slane %v517_v15, %v541_v30 }
 0x13e   :  { %v550_v37 = vrot.slane %v517_v15, %v549_v31 }
 0x1e6   :  { %v629_v3 = vpop.f32.mrf.mxu0  ;;  %v700_v8 = vpop.f32.mrf.mxu1 }
 0x1e7   :  { %v630_v11 = vadd.f32 %v629_v3, %v522_v18  ;;  %v701_v21 = vadd.f32 %v700_v8, %v530_v19 }
 0x1e8   :  { %v631_v22 = vpop.f32.mrf.mxu0  ;;  %v702_v23 = vpop.f32.mrf.mxu1 }
 0x1e9   :  { %v982_v26 = vmul.f32 -1.442695, %v630_v11  ;;  %v984_v27 = vmul.f32 -1.442695, %v701_v21  ;;  %v632_v28 = vadd.f32 %v631_v22, %v526_v20  ;;  %v703_v29 = vadd.f32 %v702_v23, %v534_v62 }
 0x1eb   :  { %1137 = vpow2.f32 %v982_v26  ;;  %v983_v32 = vmul.f32 -1.442695, %v632_v28  ;;  %v985_v33 = vmul.f32 -1.442695, %v703_v29 }
 0x1ec   :  { %1139 = vpow2.f32 %v984_v27 }
 0x1ed   :  { %1141 = vpow2.f32 %v983_v32 }
 0x1ee   :  { %1143 = vpow2.f32 %v985_v33 }
 0x1ef   :  { %v771_v38 = vpop.f32.mrf.mxu0  ;;  %v842_v39 = vpop.f32.mrf.mxu1 }
 0x1f0   :  { %v772_v40 = vadd.f32 %v771_v38, %v538_v34  ;;  %v843_v41 = vadd.f32 %v842_v39, %v546_v35 }
 0x1f1   :  { %v773_v43 = vpop.f32.mrf.mxu0  ;;  %v844_v44 = vpop.f32.mrf.mxu1 }
 0x1f2   :  { %v986_v45 = vmul.f32 -1.442695, %v772_v40  ;;  %v988_v46 = vmul.f32 -1.442695, %v843_v41  ;;  %v774_v47 = vadd.f32 %v773_v43, %v542_v36  ;;  %v845_v42 = vadd.f32 %v844_v44, %v550_v37 }
 0x1f4   :  { %1145 = vpow2.f32 %v986_v45  ;;  %v987_v48 = vmul.f32 -1.442695, %v774_v47  ;;  %v989_v49 = vmul.f32 -1.442695, %v845_v42 }
 0x1f5   :  { %1147 = vpow2.f32 %v988_v46 }
 0x1f6   :  { %1149 = vpow2.f32 %v987_v48 }
 0x1f7   :  { %1151 = vpow2.f32 %v989_v49 }
 0x1f8   :  { %v1138_v50 = vpop.eup %1137 }
 0x1f9   :  { %v1140_v52 = vpop.eup %1139  ;;  %v871_v53 = vadd.f32 1.0, %v1138_v50 }
 0x1fa   :  { %v1142_v54 = vpop.eup %1141  ;;  %v873_v55 = vadd.f32 1.0, %v1140_v52 }
 0x1fb   :  { %v1144_v56 = vpop.eup %1143  ;;  %1153 = vrcp.f32 %v871_v53  ;;  %v872_v57 = vadd.f32 1.0, %v1142_v54 }
 0x1fc   :  { %1155 = vrcp.f32 %v873_v55  ;;  %v874_v58 = vadd.f32 1.0, %v1144_v56 }
 0x1fd   :  { %1157 = vrcp.f32 %v872_v57 }
 0x1fe   :  { %1159 = vrcp.f32 %v874_v58 }
 0x201   :  { %v1146_v59 = vpop.eup %1145 }
 0x202   :  { %v1148_v60 = vpop.eup %1147  ;;  %v875_v61 = vadd.f32 1.0, %v1146_v59 }
 0x203   :  { %v1150_v63 = vpop.eup %1149  ;;  %v877_v0 = vadd.f32 1.0, %v1148_v60 }
 0x204   :  { %v1152_v1 = vpop.eup %1151  ;;  %1161 = vrcp.f32 %v875_v61  ;;  %v876_v2 = vadd.f32 1.0, %v1150_v63 }
 0x205   :  { %1163 = vrcp.f32 %v877_v0  ;;  %v878_v4 = vadd.f32 1.0, %v1152_v1 }
 0x206   :  { %1165 = vrcp.f32 %v876_v2 }
 0x207   :  { %1167 = vrcp.f32 %v878_v4 }
 0x208   :  { %v1154_v5 = vpop.eup %1153 }
 0x209   :  { %v1156_v6 = vpop.eup %1155 }
 0x20a   :  { %v1158_v7 = vpop.eup %1157 }
 0x20b   :  { %v1160_v9 = vpop.eup %1159  ;;  %v906_v10 = vcombine.low %v1154_v5, %v1158_v7 }
 0x20c   :  { %v907_v12 = vcombine.low %v1156_v6, %v1160_v9 }
 0x20d   :  { %v914_v13 = vrot.slane %v906_v10, %v1413_v51 }
 0x20e   :  { %v921_v14 = vrot.slane %v907_v12, %v1413_v51 }
 0x210   :  { %v922_v15 = vcombine.low %v914_v13, %v921_v14 }
 0x211   :  { %v1162_v16 = vpop.eup %1161 }
 0x212   :  { %v1164_v17 = vpop.eup %1163  ;;  %942 = vst [vmem:[%s1836_s10] sm:$0xff] %v922_v15 }
 0x213   :  { %v1166_v18 = vpop.eup %1165 }
 0x214   :  { %v1168_v19 = vpop.eup %1167  ;;  %v923_v20 = vcombine.low %v1162_v16, %v1166_v18 }
 0x215   :  { %v924_v62 = vcombine.low %v1164_v17, %v1168_v19 }
 0x216   :  { %v931_v3 = vrot.slane %v923_v20, %v1413_v51 }
 0x217   :  { %v938_v8 = vrot.slane %v924_v62, %v1413_v51 }
 0x219   :  { %v939_v11 = vcombine.low %v931_v3, %v938_v8 }
 0x21b   :  { %943 = vst [vmem:[%s1836_s10 + $0x8] sm:$0xff] %v939_v11 }
 0x21c   :  { %1209 = dma.done.wait [#allocation3], 32  }
 0x21d   :  { %1210 = vsyncadd [#allocation3], 4294967264 }
 0x21e   :  { %1211 = dma.done.wait [#allocation5], 32  }
 0x21f   :  { %1212 = vsyncadd [#allocation5], 4294967264 }
 0x220   :  { %974 = vsyncpa [#allocation3], 1 }
 0x221   :  { %975 = vsyncpa [#allocation5], 1 }

</bundles_post_ra>
